<compile_context>
chip_gen: v7x
topology: tpu7x:2x2x1
jax: 0.10.0
libtpu: 0.0.40
codegen_flags: <defaults>
</compile_context>

<pallas_src>
from functools import partial

import jax
import jax.numpy as jnp
from jax.experimental import pallas as pl
from jax.experimental.pallas import tpu as pltpu

EPS = 1e-12                             # F.normalize default eps
LANES = 128                             # TPU vreg lane width
TARGET_BLOCK_BYTES = 4 * 1024 * 1024    # ~4 MiB per-step row block
VMEM_LIMIT_BYTES = 48 * 1024 * 1024     # ok on v5e/v6e (128 MiB) and v7x (64 MiB)


# ----------------------------------------------------------------------------
# Kernels
# ----------------------------------------------------------------------------
def _scale_norm_kernel_plain(scale_ref, x_ref, o_ref):
    """One (rows, D) block; the last dim is a whole logical row."""
    x = x_ref[...].astype(jnp.float32)                        # (rows, D)
    sumsq = jnp.sum(x * x, axis=-1, keepdims=True)            # (rows, 1)
    # x / max(||x||, eps) == x * rsqrt(max(sumsq, eps^2)); fold scale in so the
    # full-width path is a single VPU multiply.
    coeff = scale_ref[0] * jax.lax.rsqrt(jnp.maximum(sumsq, EPS * EPS))
    o_ref[...] = (x * coeff).astype(o_ref.dtype)


def _scale_norm_kernel_packed(scale_ref, x_ref, o_ref, *, D, k):
    """Lane-dense path: each 128-lane row holds k = 128//D logical rows."""
    x = x_ref[...].astype(jnp.float32)                        # (rows_p, 128)

    # Constant 0/1 segment matrices built from 2-D iotas (no integer division).
    lane = jax.lax.broadcasted_iota(jnp.int32, (LANES, k), 0)
    seg = jax.lax.broadcasted_iota(jnp.int32, (LANES, k), 1)
    lo = seg * D
    gather_m = ((lane >= lo) & (lane < lo + D)).astype(jnp.float32)      # (128, k)
    lane_t = jax.lax.broadcasted_iota(jnp.int32, (k, LANES), 1)
    seg_t = jax.lax.broadcasted_iota(jnp.int32, (k, LANES), 0)
    lo_t = seg_t * D
    scatter_m = ((lane_t >= lo_t) & (lane_t < lo_t + D)).astype(jnp.float32)  # (k, 128)

    # Segmented sum of squares over each D-lane segment -> (rows_p, k), on the
    # otherwise-idle MXU.
    sumsq = jnp.dot(x * x, gather_m, preferred_element_type=jnp.float32)
    coeff = scale_ref[0] * jax.lax.rsqrt(jnp.maximum(sumsq, EPS * EPS))  # (rows_p, k)
    # Broadcast each segment's coefficient back across its D lanes (MXU again),
    # then a single elementwise VPU multiply and a full-width store.
    coeff_lanes = jnp.dot(coeff, scatter_m, preferred_element_type=jnp.float32)
    o_ref[...] = (x * coeff_lanes).astype(o_ref.dtype)


# ----------------------------------------------------------------------------
# Wrapper
# ----------------------------------------------------------------------------
def _pick_block_rows(num_rows, row_bytes, itemsize, target_bytes):
    if num_rows * row_bytes <= target_bytes:
        return int(num_rows)                 # single block == full dim (exempt)
    sub = max(8, 32 // itemsize)             # sublane packing: f32 -> 8, bf16 -> 16
    br = (target_bytes // row_bytes) // sub * sub
    return int(min(max(br, sub), num_rows))


def scale_norm(x, scale, *, block_rows=None,
               target_block_bytes=TARGET_BLOCK_BYTES,
               vmem_limit_bytes=VMEM_LIMIT_BYTES):
    orig_shape = x.shape
    D = orig_shape[-1]
    R = x.size // D
    itemsize = jnp.dtype(x.dtype).itemsize

    # Lane-dense packing when the last dim underfills the 128-lane vreg.
    pack = (D < LANES) and (LANES % D == 0) and (R % (LANES // D) == 0)
    if pack:
        k = LANES // D
        rows, cols = R // k, LANES
        kernel = partial(_scale_norm_kernel_packed, D=D, k=k)
    else:
        rows, cols = R, D
        kernel = _scale_norm_kernel_plain

    x2 = x.reshape(rows, cols)

    if block_rows is None:
        block_rows = _pick_block_rows(rows, cols * itemsize, itemsize,
                                      target_block_bytes)
    grid_r = pl.cdiv(rows, block_rows)

    scale_arr = jnp.asarray(scale, jnp.float32).reshape(1)

    out = pl.pallas_call(
        kernel,
        out_shape=jax.ShapeDtypeStruct((rows, cols), x.dtype),  # dtype follows input
        grid=(grid_r,),
        in_specs=[
            pl.BlockSpec(memory_space=pltpu.MemorySpace.SMEM),   # scalar scale
            pl.BlockSpec((block_rows, cols), lambda r: (r, 0)),
        ],
        out_specs=pl.BlockSpec((block_rows, cols), lambda r: (r, 0)),
        compiler_params=pltpu.CompilerParams(
            dimension_semantics=("parallel",),
            vmem_limit_bytes=vmem_limit_bytes),
    )(scale_arr, x2)
    return out.reshape(orig_shape)


# ----------------------------------------------------------------------------
# Pure-JAX reference
# ----------------------------------------------------------------------------
def reference(x, scale):
    xf = x.astype(jnp.float32)
    norm = jnp.sqrt(jnp.sum(xf * xf, axis=-1, keepdims=True))
    y = jnp.float32(scale) * xf / jnp.maximum(norm, EPS)
    return y.astype(x.dtype)


# ----------------------------------------------------------------------------
if __name__ == "__main__":
    key = jax.random.PRNGKey(0)
    kx, ks, k2, k3 = jax.random.split(key, 4)

    # Small shapes consistent with the seq module: batch=2, seq=8, hidden=32.
    B, N, D = 2, 8, 32
    x = jax.random.normal(kx, (B, N, D), jnp.float32)
    # nn.Parameter(torch.ones(())) initializes to 1; use a non-trivial value so
    # the scale multiply is actually exercised.
    scale = 1.0 + 0.5 * jax.random.uniform(ks, (), jnp.float32)

    # f32, lane-dense packed path (D=32 -> 4 rows per 128-lane row).
    out = jax.block_until_ready(scale_norm(x, scale))
    ref = jax.block_until_ready(reference(x, scale))
    assert out.shape == x.shape and out.dtype == x.dtype
    assert jnp.allclose(out, ref, rtol=1e-5, atol=1e-5), \
        float(jnp.max(jnp.abs(out - ref)))

    # bf16 path: output dtype follows input dtype.
    xb = x.astype(jnp.bfloat16)
    outb = jax.block_until_ready(scale_norm(xb, scale))
    refb = jax.block_until_ready(reference(xb, scale))
    assert outb.dtype == jnp.bfloat16
    assert jnp.allclose(outb.astype(jnp.float32), refb.astype(jnp.float32),
                        rtol=2e-2, atol=2e-2)

    # Multi-step grid with a partial (masked) last block: 24 packed rows,
    # block_rows=16 -> grid of 2, second block only half valid.
    x3 = jax.random.normal(k2, (4, 24, 32), jnp.float32)
    out3 = jax.block_until_ready(scale_norm(x3, scale, block_rows=16))
    ref3 = jax.block_until_ready(reference(x3, scale))
    assert jnp.allclose(out3, ref3, rtol=1e-5, atol=1e-5), \
        float(jnp.max(jnp.abs(out3 - ref3)))

    # Plain fall-back path (D does not divide the 128-lane vreg).
    x4 = jax.random.normal(k3, (2, 8, 48), jnp.float32)
    out4 = jax.block_until_ready(scale_norm(x4, scale))
    ref4 = jax.block_until_ready(reference(x4, scale))
    assert jnp.allclose(out4, ref4, rtol=1e-5, atol=1e-5), \
        float(jnp.max(jnp.abs(out4 - ref4)))

    print("KERNEL_OK")
</pallas_src>

<mosaic_0001>
module attributes {stable_mosaic.version = 11 : i64} {
  func.func @_scale_norm_kernel_packed(%arg0: i32, %arg1: memref<1xf32, #tpu.memory_space<smem>>, %arg2: memref<4x128xf32, #tpu.memory_space<vmem>>, %arg3: memref<4x128xf32, #tpu.memory_space<vmem>>) attributes {dimension_semantics = [#tpu.dimension_semantics<parallel>], iteration_bounds = array<i64: 1>, scalar_prefetch = 0 : i64, scratch_operands = 0 : i64, tpu.core_type = #tpu.core_type<tc>, window_params = [{transform_indices = @transform_0, window_bounds = array<i64: 1>}, {transform_indices = @transform_1, window_bounds = array<i64: 4, 128>}, {transform_indices = @transform_2, window_bounds = array<i64: 4, 128>}]} {
    %c0 = arith.constant 0 : index
    %c0_0 = arith.constant 0 : index
    %0 = vector.load %arg2[%c0, %c0_0] : memref<4x128xf32, #tpu.memory_space<vmem>>, vector<4x128xf32>
    %1 = tpu.iota {dimensions = array<i32: 0>} : vector<128x4xi32>
    %2 = tpu.iota {dimensions = array<i32: 1>} : vector<128x4xi32>
    %c32_i32 = arith.constant 32 : i32
    %3 = vector.broadcast %c32_i32 : i32 to vector<128x4xi32>
    %4 = arith.muli %2, %3 : vector<128x4xi32>
    %5 = arith.cmpi sge, %1, %4 : vector<128x4xi32>
    %c32_i32_1 = arith.constant 32 : i32
    %6 = vector.broadcast %c32_i32_1 : i32 to vector<128x4xi32>
    %7 = arith.addi %4, %6 : vector<128x4xi32>
    %8 = arith.cmpi slt, %1, %7 : vector<128x4xi32>
    %9 = arith.andi %5, %8 : vector<128x4xi1>
    %10 = arith.extui %9 : vector<128x4xi1> to vector<128x4xi32>
    %11 = arith.sitofp %10 : vector<128x4xi32> to vector<128x4xf32>
    %12 = tpu.iota {dimensions = array<i32: 1>} : vector<4x128xi32>
    %13 = tpu.iota {dimensions = array<i32: 0>} : vector<4x128xi32>
    %c32_i32_2 = arith.constant 32 : i32
    %14 = vector.broadcast %c32_i32_2 : i32 to vector<4x128xi32>
    %15 = arith.muli %13, %14 : vector<4x128xi32>
    %16 = arith.cmpi sge, %12, %15 : vector<4x128xi32>
    %c32_i32_3 = arith.constant 32 : i32
    %17 = vector.broadcast %c32_i32_3 : i32 to vector<4x128xi32>
    %18 = arith.addi %15, %17 : vector<4x128xi32>
    %19 = arith.cmpi slt, %12, %18 : vector<4x128xi32>
    %20 = arith.andi %16, %19 : vector<4x128xi1>
    %21 = arith.extui %20 : vector<4x128xi1> to vector<4x128xi32>
    %22 = arith.sitofp %21 : vector<4x128xi32> to vector<4x128xf32>
    %23 = arith.mulf %0, %0 : vector<4x128xf32>
    %cst = arith.constant dense<0.000000e+00> : vector<4x4xf32>
    %24 = tpu.matmul %23, %11, %cst {dimension_numbers = #tpu.dot_dimension_numbers<[1], [0], [0], [1], [0, 0, 1, 1], [], []>} : vector<4x128xf32>, vector<128x4xf32>, vector<4x4xf32> -> vector<4x4xf32>
    %c0_4 = arith.constant 0 : index
    %25 = memref.load %arg1[%c0_4] : memref<1xf32, #tpu.memory_space<smem>>
    %cst_5 = arith.constant 1.000000e-24 : f32
    %26 = vector.broadcast %cst_5 : f32 to vector<4x4xf32>
    %27 = arith.maximumf %24, %26 : vector<4x4xf32>
    %28 = math.rsqrt %27 : vector<4x4xf32>
    %29 = vector.broadcast %25 : f32 to vector<4x4xf32>
    %30 = arith.mulf %29, %28 : vector<4x4xf32>
    %cst_6 = arith.constant dense<0.000000e+00> : vector<4x128xf32>
    %31 = tpu.matmul %30, %22, %cst_6 {dimension_numbers = #tpu.dot_dimension_numbers<[1], [0], [0], [1], [0, 0, 1, 1], [], []>} : vector<4x4xf32>, vector<4x128xf32>, vector<4x128xf32> -> vector<4x128xf32>
    %32 = arith.mulf %0, %31 : vector<4x128xf32>
    %c0_7 = arith.constant 0 : index
    %c0_8 = arith.constant 0 : index
    %33 = vector.load %arg3[%c0_7, %c0_8] : memref<4x128xf32, #tpu.memory_space<vmem>>, vector<4x128xf32>
    tpu.vector_store %arg3[%c0_7, %c0_8], %32 {strides = array<i32>} : memref<4x128xf32, #tpu.memory_space<vmem>>, vector<4x128xf32>,
    return
  }
  func.func @transform_0(%arg0: i32) -> i32 {
    %c0_i32 = arith.constant 0 : i32
    %c0_i32_0 = arith.constant 0 : i32
    return %c0_i32 : i32
  }
  func.func @transform_1(%arg0: i32) -> (i32, i32) {
    %c0_i32 = arith.constant 0 : i32
    %c0_i32_0 = arith.constant 0 : i32
    return %arg0, %c0_i32 : i32, i32
  }
  func.func @transform_2(%arg0: i32) -> (i32, i32) {
    %c0_i32 = arith.constant 0 : i32
    %c0_i32_0 = arith.constant 0 : i32
    return %arg0, %c0_i32 : i32, i32
  }
}

</mosaic_0001>

<bundles_post_ra>
// kernel: tpu_custom_call.1
= control target key start
LH: loop header
LB: loop body
LE: loop exit
PB: predicated region body
PF: predicated region fallthrough
CT: control target
= control target key end

     0   :  { %8 = vsyncpa [#allocation4], 0  ;;  %s651_s0 = inlined_call_operand.<no memory space> [shape: f32[1], index: 0, kind: input, shape index: {}]   ;;  %s652_s1 = inlined_call_operand.hbm [shape: f32[4,128], index: 1, kind: input, shape index: {}]   ;;  %s653_s2 = inlined_call_operand.hbm [shape: f32[4,128], index: 2, kind: output, shape index: {}]  }
   0x1   :  { %9 = vsyncpa [#allocation5], 0  ;;  %s479_s9 = smov [#allocation3]   ;;  %s431_s13 = scalar_lea.hbm %s652_s1, 64 }
   0x2   :  { %s18_s10 = sshll.u32 %s479_s9, 4  ;;  %p432_p0 = scmp.ne.s32.totalorder %s652_s1, %s431_s13  ;;  %s19_s10 = int_to_ptr.vmem [resolvable:$true] %s18_s10 }
   0x3   :  { %p435_p1 = scmp.lt.u32.totalorder %s431_s13, %s652_s1 }
   0x5   :  { %p437_p2 = pnand %p435_p1, %p432_p0 }
   0x7   :  { %440 = shalt.err (!%p437_p2)
}
   0x8   :  { %s441_s18 = scalar_lea.vmem %s19_s10, 64  ;;  %p446_p4 = scmp.lt.s32.totalorder %s19_s10, %s19_s10 }
   0x9   :  { %p442_p3 = scmp.ne.s32.totalorder %s19_s10, %s441_s18  ;;  %p447_p5 = scmp.lt.s32.totalorder %s441_s18, %s441_s18 }
   0xb   :  { %p448_p6 = por %p447_p5, %p446_p4 }
   0xd   :  { %p449_p7 = pnand %p448_p6, %p442_p3 }
   0xf   :  { %452 = shalt.err (!%p449_p7)
}
  0x10   :  { %21 = dma.hbm_to_vmem [thread:$0]  %s652_s1, 64, %s19_s10, [#allocation4]   ;;  %v26_v0 = vlaneseq }
  0x11   :  { %475 = dma.done.wait [#allocation4], 64  }
  0x12   :  { %476 = vsyncadd [#allocation4], 4294967232  ;;  %v480_v1 = vmov 0.0|0.0   ;;  %v481_v2 = vmov 0.0   ;;  %v514_v3 = vshrl.u32 %v26_v0, 7  ;;  %v516_v4 = vand.u32 127, %v26_v0 }
  0x13   :  { %399 = vmatprep.subr.bf16.mxu0 %v480_v1  ;;  %394 = vmatprep.subr.mxu1 %v481_v2  ;;  %vm482_vm0 = vmmov 0   ;;  %v483_v13 = vmov 1.0|1.0   ;;  %v25_v30 = vld [vmem:[#allocation3] sm:$0xf]  ;;  %v208_v38 = vstv %s651_s0  ;;  %s484_s22 = smov [#allocation6]  }
  0x14   :  { %391 = vmatprep.mubr.msk.f32.mxu0 %vm482_vm0, %v481_v2  ;;  %396 = vmatprep.mubr.msk.f32.mxu1 %vm482_vm0, %v481_v2  ;;  %v28_v5 = vadd.s32 8, %v514_v3  ;;  %v522_v6 = vmul.u32 32, %v516_v4  ;;  %v29_v7 = vadd.s32 16, %v514_v3  ;;  %v30_v9 = vadd.s32 24, %v514_v3  ;;  %s296_s23 = sshll.u32 %s484_s22, 4  ;;  %s297_s23 = int_to_ptr.vmem [resolvable:$true] %s296_s23 }
  0x15   :  { %v31_v10 = vadd.s32 32, %v514_v3  ;;  %v32_v11 = vadd.s32 40, %v514_v3  ;;  %v33_v12 = vadd.s32 48, %v514_v3  ;;  %v34_v14 = vadd.s32 56, %v514_v3  ;;  %s453_s24 = scalar_lea.vmem %s297_s23, 64  ;;  %p458_p9 = scmp.lt.s32.totalorder %s297_s23, %s297_s23 }
  0x16   :  { %vm46_vm1 = vcmp.ge.s32.totalorder %v514_v3, %v522_v6  ;;  %v528_v8 = vadd.s32 32, %v522_v6  ;;  %vm47_vm2 = vcmp.ge.s32.totalorder %v28_v5, %v522_v6  ;;  %vm48_vm6 = vcmp.ge.s32.totalorder %v29_v7, %v522_v6  ;;  %p454_p8 = scmp.ne.s32.totalorder %s297_s23, %s453_s24  ;;  %p459_p10 = scmp.lt.s32.totalorder %s453_s24, %s453_s24 }
  0x17   :  { %vm49_vm9 = vcmp.ge.s32.totalorder %v30_v9, %v522_v6  ;;  %vm50_vm13 = vcmp.ge.s32.totalorder %v31_v10, %v522_v6  ;;  %vm51_vm0 = vcmp.ge.s32.totalorder %v32_v11, %v522_v6  ;;  %v35_v15 = vadd.s32 64, %v514_v3 }
  0x18   :  { %vm63_vm3 = vcmp.lt.s32.totalorder %v514_v3, %v528_v8  ;;  %vm64_vm4 = vcmp.lt.s32.totalorder %v28_v5, %v528_v8  ;;  %vm65_vm7 = vcmp.lt.s32.totalorder %v29_v7, %v528_v8  ;;  %vm66_vm10 = vcmp.lt.s32.totalorder %v30_v9, %v528_v8  ;;  %p460_p11 = por %p459_p10, %p458_p9 }
  0x19   :  { %vm79_vm5 = vmand %vm46_vm1, %vm63_vm3  ;;  %vm67_vm14 = vcmp.lt.s32.totalorder %v31_v10, %v528_v8  ;;  %vm68_vm1 = vcmp.lt.s32.totalorder %v32_v11, %v528_v8  ;;  %v36_v17 = vadd.s32 72, %v514_v3  ;;  %v37_v18 = vadd.s32 80, %v514_v3 }
  0x1a   :  { %vm80_vm8 = vmand %vm47_vm2, %vm64_vm4  ;;  %vm52_vm4 = vcmp.ge.s32.totalorder %v33_v12, %v522_v6  ;;  %v38_v20 = vadd.s32 88, %v514_v3  ;;  %v39_v23 = vadd.s32 96, %v514_v3  ;;  %v40_v25 = vadd.s32 104, %v514_v3  ;;  %p461_p12 = pnand %p460_p11, %p454_p8 }
  0x1b   :  { %vm400_vm11 = vmpackc.low %vm80_vm8, %vm79_vm5  ;;  %vm69_vm5 = vcmp.lt.s32.totalorder %v33_v12, %v528_v8  ;;  %vm70_vm8 = vcmp.lt.s32.totalorder %v34_v14, %v528_v8  ;;  %v41_v28 = vadd.s32 112, %v514_v3  ;;  %v42_v29 = vadd.s32 120, %v514_v3 }
  0x1c   :  { %401 = vmatpush3.bf16.msk.msra.mxu0 %vm400_vm11, %v483_v13  ;;  %vm81_vm12 = vmand %vm48_vm6, %vm65_vm7  ;;  %vm53_vm7 = vcmp.ge.s32.totalorder %v34_v14, %v522_v6  ;;  %vm54_vm11 = vcmp.ge.s32.totalorder %v35_v15, %v522_v6  ;;  %v134_v31 = vmul.f32 %v25_v30, %v25_v30  ;;  %v127_v32 = vmul.u32 32, %v514_v3 }
  0x1d   :  { %402 = vmatprep.subr.bf16.mxu0 %v480_v1  ;;  %vm82_vm15 = vmand %vm49_vm9, %vm66_vm10 }
  0x1e   :  { %vm403_vm2 = vmpackc.low %vm82_vm15, %vm81_vm12  ;;  %vm71_vm12 = vcmp.lt.s32.totalorder %v35_v15, %v528_v8  ;;  %vm72_vm15 = vcmp.lt.s32.totalorder %v36_v17, %v528_v8  ;;  %v129_v33 = vadd.s32 32, %v127_v32 }
  0x1f   :  { %vm550_vm3 = vmand %vm50_vm13, %vm67_vm14  ;;  %vm55_vm14 = vcmp.ge.s32.totalorder %v36_v17, %v522_v6 }
  0x20   :  { %404 = vmatpush3.bf16.msk.msra.mxu0 %vm403_vm2, %v483_v13  ;;  %vm84_vm6 = vmand %vm51_vm0, %vm68_vm1  ;;  %vm56_vm2 = vcmp.ge.s32.totalorder %v37_v18, %v522_v6 }
  0x21   :  { %405 = vmatprep.subr.bf16.mxu0 %v480_v1  ;;  %vm406_vm9 = vmpackc.low %vm84_vm6, %vm550_vm3  ;;  %vm73_vm3 = vcmp.lt.s32.totalorder %v37_v18, %v528_v8  ;;  %vm74_vm6 = vcmp.lt.s32.totalorder %v38_v20, %v528_v8 }
  0x22   :  { %vm564_vm10 = vmand %vm52_vm4, %vm69_vm5  ;;  %vm57_vm5 = vcmp.ge.s32.totalorder %v38_v20, %v522_v6 }
  0x23   :  { %vm571_vm13 = vmand %vm53_vm7, %vm70_vm8 }
  0x24   :  { %407 = vmatpush3.bf16.msk.msra.mxu0 %vm406_vm9, %v483_v13  ;;  %vm409_vm0 = vmpackc.low %vm571_vm13, %vm564_vm10  ;;  %vm58_vm10 = vcmp.ge.s32.totalorder %v39_v23, %v522_v6  ;;  %vm76_vm13 = vcmp.lt.s32.totalorder %v40_v25, %v528_v8 }
  0x25   :  { %408 = vmatprep.subr.bf16.mxu0 %v480_v1  ;;  %vm583_vm1 = vmand %vm54_vm11, %vm71_vm12  ;;  %vm75_vm11 = vcmp.lt.s32.totalorder %v39_v23, %v528_v8  ;;  %vm59_vm12 = vcmp.ge.s32.totalorder %v40_v25, %v522_v6 }
  0x26   :  { %vm590_vm4 = vmand %vm55_vm14, %vm72_vm15 }
  0x27   :  { %vm412_vm7 = vmpackc.low %vm590_vm4, %vm583_vm1  ;;  %vm60_vm1 = vcmp.ge.s32.totalorder %v41_v28, %v522_v6  ;;  %vm78_vm4 = vcmp.lt.s32.totalorder %v42_v29, %v528_v8 }
  0x28   :  { %410 = vmatpush3.bf16.msk.msra.mxu0 %vm409_vm0, %v483_v13  ;;  %vm602_vm8 = vmand %vm56_vm2, %vm73_vm3  ;;  %vm77_vm2 = vcmp.lt.s32.totalorder %v41_v28, %v528_v8  ;;  %vm61_vm3 = vcmp.ge.s32.totalorder %v42_v29, %v522_v6 }
  0x29   :  { %411 = vmatprep.subr.bf16.mxu0 %v480_v1  ;;  %vm607_vm9 = vmand %vm57_vm5, %vm74_vm6 }
  0x2a   :  { %vm415_vm14 = vmpackc.low %vm607_vm9, %vm602_vm8  ;;  %vm128_vm9 = vcmp.ge.s32.totalorder %v516_v4, %v127_v32 }
  0x2b   :  { %vm91_vm15 = vmand %vm58_vm10, %vm75_vm11  ;;  %vm130_vm10 = vcmp.lt.s32.totalorder %v516_v4, %v129_v33  ;;  %vm214_vm11 = vcmask 1043456  }
  0x2c   :  { %413 = vmatpush3.bf16.msk.msra.mxu0 %vm412_vm7, %v483_v13  ;;  %vm92_vm0 = vmand %vm59_vm12, %vm76_vm13  ;;  %vm210_vm13 = vcmask 31744  }
  0x2d   :  { %414 = vmatprep.subr.bf16.mxu0 %v480_v1  ;;  %vm418_vm5 = vmpackc.low %vm92_vm0, %vm91_vm15 }
  0x2e   :  { %vm93_vm6 = vmand %vm60_vm1, %vm77_vm2 }
  0x2f   :  { %vm94_vm8 = vmand %vm61_vm3, %vm78_vm4 }
  0x30   :  { %416 = vmatpush3.bf16.msk.msra.mxu0 %vm415_vm14, %v483_v13  ;;  %vm421_vm7 = vmpackc.low %vm94_vm8, %vm93_vm6 }
  0x31   :  { %417 = vmatprep.subr.bf16.mxu0 %v480_v1  ;;  %vm131_vm12 = vmand %vm128_vm9, %vm130_vm10 }
  0x32   :  { %v321_v34 = vsel %vm131_vm12, 1.0, %v481_v2 }
  0x33   :  { %395 = vmatpush3.msk.msra.mxu1 %vm214_vm11, %v321_v34 }
  0x34   :  { %419 = vmatpush3.bf16.msk.msra.mxu0 %vm418_vm5, %v483_v13 }
  0x35   :  { %420 = vmatprep.subr.bf16.mxu0 %v480_v1 }
  0x38   :  { %422 = vmatpush3.bf16.msk.msra.mxu0 %vm421_vm7, %v483_v13 }
  0x3b   :  { %392 = vmatmul.mubr.f32.vlgmr.msra.gmra.mrb[0].mxu0 %v134_v31 }
 0x10e   :  { %v201_v35 = vpop.f32.mrb[0].mxu0 }
 0x10f   :  { %v206_v36 = vmax.f32 %v201_v35, 1e-24  ;;  %v393_v37 = vpop.f32.mrb[1].mxu0 }
 0x111   :  { %429 = vrsqrt.f32 %v206_v36 }
 0x11b   :  { %v430_v39 = vpop.eup %429 }
 0x11c   :  { %v209_v40 = vmul.f32 %v430_v39, %v208_v38 }
 0x11e   :  { %397 = vmatmul.mubr.msk.f32.vlgmr.msra.gmra.mrb[0].mxu1 %vm210_vm13, %v209_v40 }
 0x1f1   :  { %v284_v41 = vpop.f32.mrb[0].mxu1 }
 0x1f2   :  { %v288_v42 = vmul.f32 %v284_v41, %v25_v30  ;;  %v398_v43 = vpop.f32.mrb[1].mxu1 }
 0x1f4   :  { %289 = vst [vmem:[#allocation6] sm:$0xf] %v288_v42 }
 0x1f5   :  { %464 = shalt.err (!%p461_p12)
}
 0x1f6   :  { %s465_s26 = scalar_lea.hbm %s653_s2, 64 }
 0x1f7   :  { %p466_p13 = scmp.ne.s32.totalorder %s653_s2, %s465_s26  ;;  %p469_p0 = scmp.lt.u32.totalorder %s465_s26, %s653_s2 }
 0x1f9   :  { %p471_p1 = pnand %p469_p0, %p466_p13 }
 0x1fb   :  { %474 = shalt.err (!%p471_p1)
}
 0x1fc   :  { %299 = dma.vmem_to_hbm [thread:$0]  %s297_s23, 64, %s653_s2, [#allocation5]  }
 0x1fd   :  { %477 = dma.done.wait [#allocation5], 64  }
 0x1fe   :  { %478 = vsyncadd [#allocation5], 4294967232 }
 0x1ff   :  { %303 = vsyncpa [#allocation4], 1 }
 0x200   :  { %304 = vsyncpa [#allocation5], 1 }

</bundles_post_ra>
